<compile_context>
chip_gen: v6e
topology: v6e:2x2x1
jax: 0.10.0
libtpu: 0.0.40
codegen_flags: <defaults>
</compile_context>

<pallas_src>
import jax
import jax.numpy as jnp
from jax.experimental import pallas as pl
from jax.experimental.pallas import tpu as pltpu


_TB_CAP = 2048  # max poses (rows) per grid step; multiple of 8, VMEM-safe on v5e/v6e/v7x


def _make_kernel(B, TB, needs_mask):
    """Kernel closure over static shape info only (rot_weight etc. are SMEM)."""

    def kernel(params_ref, pt_ref, gt_ref, pq_ref, gq_ref, out_ref, acc_ref):
        # params_ref: (3,) f32 SMEM  -> [rot_weight, 1/nt, 1/nq]
        # pt/gt: (TB, 3) blocks, pq/gq: (TB, 4) blocks (VMEM)
        # out_ref: (3,) f32 SMEM     -> [loss, loss_t, loss_q]
        # acc_ref: (2,) f32 SMEM scratch (persists across grid steps)
        i = pl.program_id(0)
        last = pl.num_programs(0) - 1

        @pl.when(i == 0)
        def _init():
            acc_ref[0] = jnp.float32(0.0)
            acc_ref[1] = jnp.float32(0.0)

        dt = jnp.abs(pt_ref[...].astype(jnp.float32) - gt_ref[...].astype(jnp.float32))
        dq = jnp.abs(pq_ref[...].astype(jnp.float32) - gq_ref[...].astype(jnp.float32))

        if needs_mask:
            # Last block may extend past B; zero out the invalid rows.
            row = jax.lax.broadcasted_iota(jnp.int32, (TB, 1), 0)
            valid = row < (B - i * TB)
            dt = jnp.where(valid, dt, 0.0)
            dq = jnp.where(valid, dq, 0.0)

        acc_ref[0] += jnp.sum(dt)
        acc_ref[1] += jnp.sum(dq)

        @pl.when(i == last)
        def _finalize():
            rot_w = params_ref[0]
            lt = acc_ref[0] * params_ref[1]
            lq = acc_ref[1] * params_ref[2]
            out_ref[0] = lt + rot_w * lq
            out_ref[1] = lt
            out_ref[2] = lq

    return kernel


def criterion_pose(pred_t, pred_q, gt_t, gt_q, rot_weight=6.0):
    """Pallas implementation of CriterionPose.forward.

    Returns (loss, loss_t, loss_q) as float32 scalars.
    """
    B, td = pred_t.shape
    Bq, qd = pred_q.shape
    assert Bq == B and gt_t.shape == pred_t.shape and gt_q.shape == pred_q.shape

    nt = B * td          # true element count for loss_t mean
    nq = B * qd          # true element count for loss_q mean

    TB = B if B <= _TB_CAP else _TB_CAP
    nb = pl.cdiv(B, TB)
    needs_mask = (nb * TB != B)

    # Runtime scalars live in SMEM -> no recompile when rot_weight changes.
    rot_w = jnp.asarray(rot_weight, dtype=jnp.float32).reshape(())
    params = jnp.stack([rot_w,
                        jnp.float32(1.0 / nt),
                        jnp.float32(1.0 / nq)])

    in_bytes = (nt * (jnp.dtype(pred_t.dtype).itemsize + jnp.dtype(gt_t.dtype).itemsize)
                + nq * (jnp.dtype(pred_q.dtype).itemsize + jnp.dtype(gt_q.dtype).itemsize))
    cost = pl.CostEstimate(flops=3 * (nt + nq),
                           transcendentals=0,
                           bytes_accessed=in_bytes + 12 + 12)

    kernel = _make_kernel(B, TB, needs_mask)

    out = pl.pallas_call(
        kernel,
        out_shape=jax.ShapeDtypeStruct((3,), jnp.float32),
        grid=(nb,),
        in_specs=[
            pl.BlockSpec(memory_space=pltpu.MemorySpace.SMEM),   # params
            pl.BlockSpec((TB, td), lambda i: (i, 0)),            # pred_t
            pl.BlockSpec((TB, td), lambda i: (i, 0)),            # gt_t
            pl.BlockSpec((TB, qd), lambda i: (i, 0)),            # pred_q
            pl.BlockSpec((TB, qd), lambda i: (i, 0)),            # gt_q
        ],
        out_specs=pl.BlockSpec(memory_space=pltpu.MemorySpace.SMEM),
        scratch_shapes=[pltpu.SMEM((2,), jnp.float32)],
        compiler_params=pltpu.CompilerParams(
            dimension_semantics=("arbitrary",)),
        cost_estimate=cost,
    )(params, pred_t, gt_t, pred_q, gt_q)

    # TODO(synk): for best perf at tiny B this loss should be fused into the
    # producer kernel; standalone it is launch-latency bound by construction.
    return out[0], out[1], out[2]


def _ref(pred_t, pred_q, gt_t, gt_q, rot_weight):
    ref_t = jnp.mean(jnp.abs(pred_t.astype(jnp.float32) - gt_t.astype(jnp.float32)))
    ref_q = jnp.mean(jnp.abs(pred_q.astype(jnp.float32) - gt_q.astype(jnp.float32)))
    return 1.0 * ref_t + rot_weight * ref_q, ref_t, ref_q


if __name__ == "__main__":
    key = jax.random.PRNGKey(0)
    k1, k2, k3, k4 = jax.random.split(key, 4)

    # Small (realistic) case: grid degenerates to a single step.
    B = 8
    pred_t = jax.random.normal(k1, (B, 3), dtype=jnp.float32)
    pred_q = jax.random.normal(k2, (B, 4), dtype=jnp.float32)
    gt_t = jax.random.normal(k3, (B, 3), dtype=jnp.float32)
    gt_q = jax.random.normal(k4, (B, 4), dtype=jnp.float32)

    loss, loss_t, loss_q = criterion_pose(pred_t, pred_q, gt_t, gt_q, rot_weight=6.0)
    jax.block_until_ready((loss, loss_t, loss_q))

    ref, ref_t, ref_q = _ref(pred_t, pred_q, gt_t, gt_q, 6.0)
    assert jnp.allclose(loss_t, ref_t, atol=1e-6), (loss_t, ref_t)
    assert jnp.allclose(loss_q, ref_q, atol=1e-6), (loss_q, ref_q)
    assert jnp.allclose(loss, ref, atol=1e-5), (loss, ref)

    # Large / ragged case: exercises grid > 1, accumulation and row masking.
    B2 = 2100
    j1, j2, j3, j4 = jax.random.split(jax.random.PRNGKey(1), 4)
    p_t2 = jax.random.normal(j1, (B2, 3), dtype=jnp.float32)
    p_q2 = jax.random.normal(j2, (B2, 4), dtype=jnp.float32)
    g_t2 = jax.random.normal(j3, (B2, 3), dtype=jnp.float32)
    g_q2 = jax.random.normal(j4, (B2, 4), dtype=jnp.float32)

    loss2, loss_t2, loss_q2 = criterion_pose(p_t2, p_q2, g_t2, g_q2, rot_weight=3.0)
    jax.block_until_ready((loss2, loss_t2, loss_q2))

    ref2, ref_t2, ref_q2 = _ref(p_t2, p_q2, g_t2, g_q2, 3.0)
    assert jnp.allclose(loss_t2, ref_t2, atol=1e-5, rtol=1e-5), (loss_t2, ref_t2)
    assert jnp.allclose(loss_q2, ref_q2, atol=1e-5, rtol=1e-5), (loss_q2, ref_q2)
    assert jnp.allclose(loss2, ref2, atol=1e-4, rtol=1e-5), (loss2, ref2)

    print("KERNEL_OK")
</pallas_src>

<mosaic_0001>
module attributes {stable_mosaic.version = 11 : i64} {
  func.func @kernel(%arg0: i32, %arg1: memref<3xf32, #tpu.memory_space<smem>>, %arg2: memref<8x3xf32, #tpu.memory_space<vmem>>, %arg3: memref<8x3xf32, #tpu.memory_space<vmem>>, %arg4: memref<8x4xf32, #tpu.memory_space<vmem>>, %arg5: memref<8x4xf32, #tpu.memory_space<vmem>>, %arg6: memref<3xf32, #tpu.memory_space<smem>>, %arg7: memref<2xf32, #tpu.memory_space<smem>>) attributes {dimension_semantics = [#tpu.dimension_semantics<arbitrary>], iteration_bounds = array<i64: 1>, scalar_prefetch = 0 : i64, scratch_operands = 1 : i64, tpu.core_type = #tpu.core_type<tc>, window_params = [{transform_indices = @transform_0, window_bounds = array<i64: 3>}, {transform_indices = @transform_1, window_bounds = array<i64: 8, 3>}, {transform_indices = @transform_2, window_bounds = array<i64: 8, 3>}, {transform_indices = @transform_3, window_bounds = array<i64: 8, 4>}, {transform_indices = @transform_4, window_bounds = array<i64: 8, 4>}, {transform_indices = @transform_5, window_bounds = array<i64: 3>}]} {
    %c0_i32 = arith.constant 0 : i32
    %0 = arith.cmpi eq, %arg0, %c0_i32 : i32
    %1 = arith.extui %0 : i1 to i32
    %c0_i32_0 = arith.constant 0 : i32
    %2 = arith.cmpi ne, %1, %c0_i32_0 : i32
    scf.if %2 {
      %cst_14 = arith.constant 0.000000e+00 : f32
      %c0_15 = arith.constant 0 : index
      %28 = memref.load %arg7[%c0_15] : memref<2xf32, #tpu.memory_space<smem>>
      memref.store %cst_14, %arg7[%c0_15] : memref<2xf32, #tpu.memory_space<smem>>
      %cst_16 = arith.constant 0.000000e+00 : f32
      %c1_17 = arith.constant 1 : index
      %29 = memref.load %arg7[%c1_17] : memref<2xf32, #tpu.memory_space<smem>>
      memref.store %cst_16, %arg7[%c1_17] : memref<2xf32, #tpu.memory_space<smem>>
    } else {
    }
    %c0 = arith.constant 0 : index
    %c0_1 = arith.constant 0 : index
    %3 = vector.load %arg2[%c0, %c0_1] : memref<8x3xf32, #tpu.memory_space<vmem>>, vector<8x3xf32>
    %c0_2 = arith.constant 0 : index
    %c0_3 = arith.constant 0 : index
    %4 = vector.load %arg3[%c0_2, %c0_3] : memref<8x3xf32, #tpu.memory_space<vmem>>, vector<8x3xf32>
    %5 = arith.subf %3, %4 : vector<8x3xf32>
    %6 = math.absf %5 : vector<8x3xf32>
    %c0_4 = arith.constant 0 : index
    %c0_5 = arith.constant 0 : index
    %7 = vector.load %arg4[%c0_4, %c0_5] : memref<8x4xf32, #tpu.memory_space<vmem>>, vector<8x4xf32>
    %c0_6 = arith.constant 0 : index
    %c0_7 = arith.constant 0 : index
    %8 = vector.load %arg5[%c0_6, %c0_7] : memref<8x4xf32, #tpu.memory_space<vmem>>, vector<8x4xf32>
    %9 = arith.subf %7, %8 : vector<8x4xf32>
    %10 = math.absf %9 : vector<8x4xf32>
    %c0_8 = arith.constant 0 : index
    %11 = memref.load %arg7[%c0_8] : memref<2xf32, #tpu.memory_space<smem>>
    %12 = vector.shape_cast %6 : vector<8x3xf32> to vector<1x8x3xf32>
    %cst = arith.constant dense<0.000000e+00> : vector<1xf32>
    %13 = vector.multi_reduction <add>, %12, %cst [1, 2] : vector<1x8x3xf32> to vector<1xf32>
    %14 = vector.shape_cast %13 : vector<1xf32> to vector<1x1x1xf32>
    %15 = vector.extract %14[0, 0, 0] : f32 from vector<1x1x1xf32>
    %16 = arith.addf %11, %15 : f32
    %c0_9 = arith.constant 0 : index
    %17 = memref.load %arg7[%c0_9] : memref<2xf32, #tpu.memory_space<smem>>
    memref.store %16, %arg7[%c0_9] : memref<2xf32, #tpu.memory_space<smem>>
    %c1 = arith.constant 1 : index
    %18 = memref.load %arg7[%c1] : memref<2xf32, #tpu.memory_space<smem>>
    %19 = vector.shape_cast %10 : vector<8x4xf32> to vector<1x8x4xf32>
    %cst_10 = arith.constant dense<0.000000e+00> : vector<1xf32>
    %20 = vector.multi_reduction <add>, %19, %cst_10 [1, 2] : vector<1x8x4xf32> to vector<1xf32>
    %21 = vector.shape_cast %20 : vector<1xf32> to vector<1x1x1xf32>
    %22 = vector.extract %21[0, 0, 0] : f32 from vector<1x1x1xf32>
    %23 = arith.addf %18, %22 : f32
    %c1_11 = arith.constant 1 : index
    %24 = memref.load %arg7[%c1_11] : memref<2xf32, #tpu.memory_space<smem>>
    memref.store %23, %arg7[%c1_11] : memref<2xf32, #tpu.memory_space<smem>>
    %c0_i32_12 = arith.constant 0 : i32
    %25 = arith.cmpi eq, %arg0, %c0_i32_12 : i32
    %26 = arith.extui %25 : i1 to i32
    %c0_i32_13 = arith.constant 0 : i32
    %27 = arith.cmpi ne, %26, %c0_i32_13 : i32
    scf.if %27 {
      %c0_14 = arith.constant 0 : index
      %28 = memref.load %arg1[%c0_14] : memref<3xf32, #tpu.memory_space<smem>>
      %c0_15 = arith.constant 0 : index
      %29 = memref.load %arg7[%c0_15] : memref<2xf32, #tpu.memory_space<smem>>
      %c1_16 = arith.constant 1 : index
      %30 = memref.load %arg1[%c1_16] : memref<3xf32, #tpu.memory_space<smem>>
      %31 = arith.mulf %29, %30 : f32
      %c1_17 = arith.constant 1 : index
      %32 = memref.load %arg7[%c1_17] : memref<2xf32, #tpu.memory_space<smem>>
      %c2 = arith.constant 2 : index
      %33 = memref.load %arg1[%c2] : memref<3xf32, #tpu.memory_space<smem>>
      %34 = arith.mulf %32, %33 : f32
      %35 = arith.mulf %28, %34 : f32
      %36 = arith.addf %31, %35 : f32
      %c0_18 = arith.constant 0 : index
      %37 = memref.load %arg6[%c0_18] : memref<3xf32, #tpu.memory_space<smem>>
      memref.store %36, %arg6[%c0_18] : memref<3xf32, #tpu.memory_space<smem>>
      %c1_19 = arith.constant 1 : index
      %38 = memref.load %arg6[%c1_19] : memref<3xf32, #tpu.memory_space<smem>>
      memref.store %31, %arg6[%c1_19] : memref<3xf32, #tpu.memory_space<smem>>
      %c2_20 = arith.constant 2 : index
      %39 = memref.load %arg6[%c2_20] : memref<3xf32, #tpu.memory_space<smem>>
      memref.store %34, %arg6[%c2_20] : memref<3xf32, #tpu.memory_space<smem>>
    } else {
    }
    return
  }
  func.func @transform_0(%arg0: i32) -> i32 {
    %c0_i32 = arith.constant 0 : i32
    %c0_i32_0 = arith.constant 0 : i32
    return %c0_i32 : i32
  }
  func.func @transform_1(%arg0: i32) -> (i32, i32) {
    %c0_i32 = arith.constant 0 : i32
    %c0_i32_0 = arith.constant 0 : i32
    return %arg0, %c0_i32 : i32, i32
  }
  func.func @transform_2(%arg0: i32) -> (i32, i32) {
    %c0_i32 = arith.constant 0 : i32
    %c0_i32_0 = arith.constant 0 : i32
    return %arg0, %c0_i32 : i32, i32
  }
  func.func @transform_3(%arg0: i32) -> (i32, i32) {
    %c0_i32 = arith.constant 0 : i32
    %c0_i32_0 = arith.constant 0 : i32
    return %arg0, %c0_i32 : i32, i32
  }
  func.func @transform_4(%arg0: i32) -> (i32, i32) {
    %c0_i32 = arith.constant 0 : i32
    %c0_i32_0 = arith.constant 0 : i32
    return %arg0, %c0_i32 : i32, i32
  }
  func.func @transform_5(%arg0: i32) -> i32 {
    %c0_i32 = arith.constant 0 : i32
    %c0_i32_0 = arith.constant 0 : i32
    return %c0_i32 : i32
  }
}

</mosaic_0001>

<bundles_post_ra>
// kernel: tpu_custom_call.1
= control target key start
LH: loop header
LB: loop body
LE: loop exit
PB: predicated region body
PF: predicated region fallthrough
CT: control target
= control target key end

     0   :  { %10 = vsyncpa [#allocation5], 0  ;;  %s196_s0 = inlined_call_operand.vmem [shape: f32[3], index: 0, kind: input, shape index: {}]   ;;  %s197_s1 = inlined_call_operand.vmem [shape: f32[8,3], index: 1, kind: input, shape index: {}]   ;;  %s198_s2 = inlined_call_operand.vmem [shape: f32[8,3], index: 2, kind: input, shape index: {}]   ;;  %s199_s3 = inlined_call_operand.vmem [shape: f32[8,4], index: 3, kind: input, shape index: {}]   ;;  %s200_s4 = inlined_call_operand.vmem [shape: f32[8,4], index: 4, kind: input, shape index: {}]   ;;  %s201_s5 = inlined_call_operand.hbm [shape: f32[3], index: 5, kind: output, shape index: {}]  }
   0x1   :  { %11 = vsyncpa [#allocation4], 0  ;;  %s18_s20 = sshll.u32 %s196_s0, 4  ;;  %s19_s20 = int_to_ptr.vmem [resolvable:$true] %s18_s20 }
   0x2   :  { %s122_s21 = scalar_lea.vmem %s19_s20, 16  ;;  %p127_p1 = scmp.lt.s32.totalorder %s19_s20, %s19_s20 }
   0x3   :  { %p123_p0 = scmp.ne.s32.totalorder %s19_s20, %s122_s21  ;;  %p128_p2 = scmp.lt.s32.totalorder %s122_s21, %s122_s21 }
   0x5   :  { %p129_p3 = por %p128_p2, %p127_p1 }
   0x7   :  { %p130_p4 = pnand %p129_p3, %p123_p0 }
   0x9   :  { %133 = shalt.err (!%p130_p4)
}
   0xa   :  { %s146_s22 = smov [#allocation3]  }
   0xb   :  { %21 = dma.vmem_to_smem %s19_s20, 16, %s146_s22, [#allocation5]  }
   0xc   :  { %142 = dma.done.wait [#allocation5], 16  }
   0xd   :  { %143 = vsyncadd [#allocation5], 4294967280 }
   0xe   :  { %33 = sfence }
   0xf   :  { %v42_v0 = vld [vmem:[%s197_s1] sm:$0xff]  ;;  %vm51_vm0 = vcmask 23552   ;;  %vm66_vm1 = vcmask 31744   ;;  %s113_s1 = sld [smem:[#allocation3 + $0x1]]  ;;  %s147_s10 = smov [#allocation6]  }
  0x10   :  { %v43_v1 = vld [vmem:[%s198_s2] sm:$0xff]  ;;  %s115_s2 = sld [smem:[#allocation3 + $0x2]] }
  0x11   :  { %v46_v2 = vld [vmem:[%s199_s3] sm:$0xff]  ;;  %v44_v3 = vsub.f32 %v42_v0, %v43_v1  ;;  %s83_s3 = sld [smem:[#allocation3]] }
  0x12   :  { %v47_v4 = vld [vmem:[%s200_s4] sm:$0xff] }
  0x13   :  { %v48_v5 = vsub.f32 %v46_v2, %v47_v4  ;;  %v45_v6 = vand.u32 2147483647, %v44_v3 }
  0x15   :  { %v49_v7 = vand.u32 2147483647, %v48_v5  ;;  %v52_v8 = vsel %vm51_vm0, %v45_v6, 0.0 }
  0x16   :  { %53 = vadd.xlane.f32.xlu0 %v52_v8 }
  0x17   :  { %v67_v9 = vsel %vm66_vm1, %v49_v7, 0.0 }
  0x1a   :  { %68 = vadd.xlane.f32.xlu0 %v67_v9 }
  0x9f   :  { %v54_v10 = vpop.xlane.xlu0 %53 }
  0xa0   :  { %v55_v11 = vrot.slane %v54_v10, 4 }
  0xa2   :  { %v56_v12 = vadd.f32 %v55_v11, %v54_v10 }
  0xa3   :  { %v69_v13 = vpop.xlane.xlu0 %68 }
  0xa4   :  { %v57_v14 = vrot.slane %v56_v12, 2  ;;  %v70_v15 = vrot.slane %v69_v13, 4 }
  0xa6   :  { %v71_v16 = vadd.f32 %v70_v15, %v69_v13  ;;  %v58_v17 = vadd.f32 %v57_v14, %v56_v12 }
  0xa8   :  { %v72_v18 = vrot.slane %v71_v16, 2  ;;  %v59_v19 = vrot.slane %v58_v17, 1 }
  0xaa   :  { %v73_v20 = vadd.f32 %v72_v18, %v71_v16  ;;  %v60_v21 = vadd.f32 %v59_v19, %v58_v17 }
  0xac   :  { %116 = vpush %v60_v21  ;;  %v74_v22 = vrot.slane %v73_v20, 1 }
  0xae   :  { %v75_v23 = vadd.f32 %v74_v22, %v73_v20 }
  0xb0   :  { %118 = vpush %v75_v23 }
  0xdd   :  { %s117_s4 = spop %116 }
  0xde   :  { %s86_s30 = smul.f32 %s117_s4, %s113_s1 }
  0xe0   :  { %95 = sst [smem:[#allocation6 + $0x1]] %s86_s30 }
  0xe1   :  { %s119_s6 = spop %118 }
  0xe2   :  { %s89_s7 = smul.f32 %s119_s6, %s115_s2 }
  0xe4   :  { %s90_s8 = smul.f32 %s89_s7, %s83_s3  ;;  %97 = sst [smem:[#allocation6 + $0x2]] %s89_s7 }
  0xe6   :  { %s91_s9 = sadd.f32 %s90_s8, %s86_s30 }
  0xe8   :  { %93 = sst [smem:[#allocation6]] %s91_s9 }
  0xe9   :  { %105 = dma.smem_to_hbm %s147_s10, 16, %s201_s5, [#allocation4]  }
  0xea   :  { %144 = dma.done.wait [#allocation4], 16  }
  0xeb   :  { %145 = vsyncadd [#allocation4], 4294967280 }
  0xec   :  { %109 = sfence }
  0xed   :  { %110 = vsyncpa [#allocation4], 1 }
  0xee   :  { %111 = vsyncpa [#allocation5], 1 }

</bundles_post_ra>
